<compile_context>
chip_gen: v7x
topology: tpu7x:2x2x1
jax: 0.10.0
libtpu: 0.0.40
codegen_flags: <defaults>
</compile_context>

<pallas_src>
import functools

import jax
import jax.numpy as jnp
from jax import lax
from jax.experimental import pallas as pl
from jax.experimental.pallas import tpu as pltpu

EPS = 1e-5
LANES = 128                    # channel dims padded to multiples of this
ROW_TILE = 256                 # pixel-row tile (512-1024 is the production sweet
                               # spot; 256 keeps the toy test multi-tile)
VMEM_LIMIT = 32 * 1024 * 1024  # explicit scoped-VMEM budget, safe on v5e/v6e/v7x


def _compiler_params():
    return pltpu.CompilerParams(
        dimension_semantics=("parallel",),   # row tiles are independent
        vmem_limit_bytes=VMEM_LIMIT,
    )


def _ceil_to(x, m):
    return (x + m - 1) // m * m


def _row_plan(rows, max_tile=ROW_TILE):
    tile = min(max_tile, _ceil_to(rows, 16))
    rpad = _ceil_to(rows, tile)
    return tile, rpad, rpad // tile


def _pad_axis(a, target, axis):
    pad = target - a.shape[axis]
    if pad <= 0:
        return a
    widths = [(0, 0)] * a.ndim
    widths[axis] = (0, pad)
    return jnp.pad(a, widths)


# ----------------------------------------------------------------------------
# Pallas kernels
# ----------------------------------------------------------------------------
def _row_mask(rows, tile):
    """(tile, 1) f32 mask selecting real (non-padded) pixel rows of this tile."""
    ridx = pl.program_id(0) * tile + lax.broadcasted_iota(jnp.int32, (tile, 1), 0)
    return (ridx < rows).astype(jnp.float32)


def _emit_stats(y, mask, s_ref, q_ref):
    """Per-tile partial per-channel sum and sum-of-squares (f32)."""
    ym = y * mask
    ps = jnp.sum(ym, axis=0)            # (C,)
    pq = jnp.sum(ym * ym, axis=0)       # (C,)
    s_ref[...] = jnp.broadcast_to(ps[None, None, :], s_ref.shape)
    q_ref[...] = jnp.broadcast_to(pq[None, None, :], q_ref.shape)


def _matmul_stats_kernel(x_ref, w_ref, y_ref, s_ref, q_ref, *, rows, tile):
    """y = x @ w (f32 accumulation) + partial BN statistics of y."""
    y = jnp.dot(x_ref[...], w_ref[...], preferred_element_type=jnp.float32)
    y_ref[...] = y
    _emit_stats(y, _row_mask(rows, tile), s_ref, q_ref)


def _bn_act_kernel(y_ref, sc_ref, sh_ref, o_ref):
    """o = relu(y * scale + shift)   (per-channel affine == BatchNorm apply)."""
    o_ref[...] = jnp.maximum(
        y_ref[...] * sc_ref[...] + sh_ref[...], 0.0).astype(o_ref.dtype)


def _bn_act_matmul_stats_kernel(y_ref, sc_ref, sh_ref, w_ref,
                                o_ref, s_ref, q_ref, *, rows, tile, mxu_dtype):
    """o = relu(y*scale+shift) @ w (f32 accumulation) + partial BN stats of o."""
    a = jnp.maximum(y_ref[...] * sc_ref[...] + sh_ref[...], 0.0)
    y = jnp.dot(a.astype(mxu_dtype), w_ref[...],
                preferred_element_type=jnp.float32)
    o_ref[...] = y
    _emit_stats(y, _row_mask(rows, tile), s_ref, q_ref)


def _bn_add_relu_kernel(y_ref, scm_ref, shm_ref, s_ref, scs_ref, shs_ref, o_ref):
    """o = relu(bn3(y) + bn_sc(shortcut)); identity shortcut = scale 1 / shift 0."""
    main = y_ref[...] * scm_ref[...] + shm_ref[...]
    short = s_ref[...].astype(jnp.float32) * scs_ref[...] + shs_ref[...]
    o_ref[...] = jnp.maximum(main + short, 0.0)


# ----------------------------------------------------------------------------
# pallas_call wrappers (row-tiled, pipelined, "parallel" grid)
# ----------------------------------------------------------------------------
def _stats_specs(n, tile, cout):
    out_specs = (pl.BlockSpec((tile, cout), lambda i: (i, 0)),
                 pl.BlockSpec((1, 8, cout), lambda i: (i, 0, 0)),
                 pl.BlockSpec((1, 8, cout), lambda i: (i, 0, 0)))
    out_shape = (jax.ShapeDtypeStruct((n * tile, cout), jnp.float32),
                 jax.ShapeDtypeStruct((n, 8, cout), jnp.float32),
                 jax.ShapeDtypeStruct((n, 8, cout), jnp.float32))
    return out_specs, out_shape


def _matmul_bn_stats(x2d, w2d, rows):
    tile, rpad, n = _row_plan(rows)
    x2d = _pad_axis(x2d, rpad, 0)
    k, c = x2d.shape[1], w2d.shape[1]
    out_specs, out_shape = _stats_specs(n, tile, c)
    y, ps, pq = pl.pallas_call(
        functools.partial(_matmul_stats_kernel, rows=rows, tile=tile),
        grid=(n,),
        in_specs=[pl.BlockSpec((tile, k), lambda i: (i, 0)),
                  pl.BlockSpec((k, c), lambda i: (0, 0))],
        out_specs=out_specs,
        out_shape=out_shape,
        compiler_params=_compiler_params(),
    )(x2d, w2d)
    return y, ps[:, 0, :].sum(axis=0), pq[:, 0, :].sum(axis=0)


def _bn_act(y, scale, shift, rows, out_dtype):
    tile, rpad, n = _row_plan(rows)
    y = _pad_axis(y, rpad, 0)
    c = y.shape[1]
    return pl.pallas_call(
        _bn_act_kernel,
        grid=(n,),
        in_specs=[pl.BlockSpec((tile, c), lambda i: (i, 0)),
                  pl.BlockSpec((1, c), lambda i: (0, 0)),
                  pl.BlockSpec((1, c), lambda i: (0, 0))],
        out_specs=pl.BlockSpec((tile, c), lambda i: (i, 0)),
        out_shape=jax.ShapeDtypeStruct((rpad, c), out_dtype),
        compiler_params=_compiler_params(),
    )(y, scale, shift)


def _bn_act_matmul_bn_stats(y, scale, shift, w2d, rows, mxu_dtype):
    tile, rpad, n = _row_plan(rows)
    y = _pad_axis(y, rpad, 0)
    cin, cout = y.shape[1], w2d.shape[1]
    out_specs, out_shape = _stats_specs(n, tile, cout)
    out, ps, pq = pl.pallas_call(
        functools.partial(_bn_act_matmul_stats_kernel,
                          rows=rows, tile=tile, mxu_dtype=mxu_dtype),
        grid=(n,),
        in_specs=[pl.BlockSpec((tile, cin), lambda i: (i, 0)),
                  pl.BlockSpec((1, cin), lambda i: (0, 0)),
                  pl.BlockSpec((1, cin), lambda i: (0, 0)),
                  pl.BlockSpec((cin, cout), lambda i: (0, 0))],
        out_specs=out_specs,
        out_shape=out_shape,
        compiler_params=_compiler_params(),
    )(y, scale, shift, w2d)
    return out, ps[:, 0, :].sum(axis=0), pq[:, 0, :].sum(axis=0)


def _bn_add_relu(y, sc_m, sh_m, shortcut, sc_s, sh_s, rows):
    tile, rpad, n = _row_plan(rows)
    y = _pad_axis(y, rpad, 0)
    shortcut = _pad_axis(shortcut, rpad, 0)
    c = y.shape[1]
    return pl.pallas_call(
        _bn_add_relu_kernel,
        grid=(n,),
        in_specs=[pl.BlockSpec((tile, c), lambda i: (i, 0)),
                  pl.BlockSpec((1, c), lambda i: (0, 0)),
                  pl.BlockSpec((1, c), lambda i: (0, 0)),
                  pl.BlockSpec((tile, c), lambda i: (i, 0)),
                  pl.BlockSpec((1, c), lambda i: (0, 0)),
                  pl.BlockSpec((1, c), lambda i: (0, 0))],
        out_specs=pl.BlockSpec((tile, c), lambda i: (i, 0)),
        out_shape=jax.ShapeDtypeStruct((rpad, c), jnp.float32),
        compiler_params=_compiler_params(),
    )(y, sc_m, sh_m, shortcut, sc_s, sh_s)


# ----------------------------------------------------------------------------
# JAX-side glue (layout / patch extraction / tiny stat combines)
# ----------------------------------------------------------------------------
def _im2col_3x3(x_nhwc, stride):
    """3x3 / pad=1 patches -> (N*Ho*Wo, 9*C); column order (ky, kx, cin)."""
    n, h, w, c = x_nhwc.shape
    ho = (h - 1) // stride + 1
    wo = (w - 1) // stride + 1
    xp = jnp.pad(x_nhwc, ((0, 0), (1, 1), (1, 1), (0, 0)))
    cols = []
    for ky in range(3):
        for kx in range(3):
            cols.append(xp[:, ky:ky + stride * (ho - 1) + 1:stride,
                             kx:kx + stride * (wo - 1) + 1:stride, :])
    patches = jnp.concatenate(cols, axis=-1)
    return patches.reshape(n * ho * wo, 9 * c), ho, wo


def _w1x1_mat(w, cin_p, cout_p, dtype):
    """torch (Cout, Cin, 1, 1) -> channel-padded (Cin_p, Cout_p)."""
    cout, cin = w.shape[0], w.shape[1]
    m = jnp.zeros((cin_p, cout_p), jnp.float32).at[:cin, :cout].set(w[:, :, 0, 0].T)
    return m.astype(dtype)


def _w3x3_mat(w, cin_p, cout_p, dtype):
    """torch (Cout, Cin, 3, 3) -> (9*Cin_p, Cout_p) matching _im2col_3x3 order."""
    cout, cin = w.shape[0], w.shape[1]
    wt = jnp.transpose(w, (2, 3, 1, 0))                           # (3,3,Cin,Cout)
    m = jnp.zeros((3, 3, cin_p, cout_p), jnp.float32).at[:, :, :cin, :cout].set(wt)
    return m.reshape(9 * cin_p, cout_p).astype(dtype)


def _bn_scale_shift(s, q, count, gamma, beta, c_pad):
    """Per-channel BN affine (scale, shift) from sum / sum-of-squares."""
    g = jnp.zeros((c_pad,), jnp.float32).at[:gamma.shape[0]].set(gamma)
    b = jnp.zeros((c_pad,), jnp.float32).at[:beta.shape[0]].set(beta)
    mean = s / count
    var = jnp.maximum(q / count - mean * mean, 0.0)   # biased (training-mode) var
    scale = g * lax.rsqrt(var + EPS)
    shift = b - mean * scale
    return scale.reshape(1, -1), shift.reshape(1, -1)


# ----------------------------------------------------------------------------
# Bottleneck forward
# ----------------------------------------------------------------------------
def bottleneck_forward(x_nchw, params, stride, mxu_dtype=jnp.bfloat16):
    """Bottleneck forward (training-mode BatchNorm) via Pallas TPU kernels.

    mxu_dtype: dtype fed to the MXU matmuls (bf16 recommended on v6e/v7x);
               accumulation, BN statistics and BN math stay float32.
    """
    n, cin, h, w = x_nchw.shape
    planes = params["w1"].shape[0]
    cout = params["w3"].shape[0]                      # expansion * planes
    cin_p = _ceil_to(cin, LANES)
    p_p = _ceil_to(planes, LANES)
    cout_p = _ceil_to(cout, LANES)

    # NCHW -> NHWC once at the module boundary (channels-last == lane-dense).
    x_nhwc = jnp.transpose(x_nchw, (0, 2, 3, 1))
    rows1 = n * h * w
    x2d = _pad_axis(x_nhwc.reshape(rows1, cin), cin_p, 1)          # f32

    # conv1 (1x1) + bn1 statistics
    w1 = _w1x1_mat(params["w1"], cin_p, p_p, mxu_dtype)
    y1, s1, q1 = _matmul_bn_stats(x2d.astype(mxu_dtype), w1, rows1)
    sc1, sh1 = _bn_scale_shift(s1, q1, rows1, params["g1"], params["b1"], p_p)

    # bn1 + relu (emitted in mxu_dtype: halves HBM traffic of the im2col below)
    a1 = _bn_act(y1, sc1, sh1, rows1, mxu_dtype)[:rows1].reshape(n, h, w, p_p)

    # conv2 (3x3, stride, pad=1) + bn2 statistics
    patches, ho, wo = _im2col_3x3(a1, stride)
    rows2 = n * ho * wo
    w2 = _w3x3_mat(params["w2"], p_p, p_p, mxu_dtype)
    y2, s2, q2 = _matmul_bn_stats(patches, w2, rows2)
    sc2, sh2 = _bn_scale_shift(s2, q2, rows2, params["g2"], params["b2"], p_p)

    # bn2 + relu fused into conv3 (1x1) + bn3 statistics
    w3 = _w1x1_mat(params["w3"], p_p, cout_p, mxu_dtype)
    y3, s3, q3 = _bn_act_matmul_bn_stats(y2, sc2, sh2, w3, rows2, mxu_dtype)
    sc3, sh3 = _bn_scale_shift(s3, q3, rows2, params["g3"], params["b3"], cout_p)

    # shortcut branch
    if stride != 1 or cin != cout:
        xs = _pad_axis(x_nhwc[:, ::stride, ::stride, :].reshape(rows2, cin), cin_p, 1)
        wsc = _w1x1_mat(params["wsc"], cin_p, cout_p, mxu_dtype)
        ysc, ss, qs = _matmul_bn_stats(xs.astype(mxu_dtype), wsc, rows2)
        scs, shs = _bn_scale_shift(ss, qs, rows2, params["gsc"], params["bsc"], cout_p)
        shortcut = ysc
    else:                                  # identity: cin == cout, stride == 1
        shortcut = x2d
        scs = jnp.ones((1, cout_p), jnp.float32)
        shs = jnp.zeros((1, cout_p), jnp.float32)

    # bn3 affine + shortcut affine + add + relu (fused epilogue)
    out2d = _bn_add_relu(y3, sc3, sh3, shortcut, scs, shs, rows2)
    out = out2d[:rows2, :cout].reshape(n, ho, wo, cout)
    return jnp.transpose(out, (0, 3, 1, 2))


# ----------------------------------------------------------------------------
# Parameter init + pure-JAX reference (for correctness checking only)
# ----------------------------------------------------------------------------
def init_params(key, in_planes, planes, stride, expansion=4):
    out_planes = expansion * planes
    ks = jax.random.split(key, 12)

    def conv_w(k, co, ci, ksz):
        fan_in = ci * ksz * ksz
        return jax.random.normal(k, (co, ci, ksz, ksz), jnp.float32) * (2.0 / fan_in) ** 0.5

    def gamma(k, c):
        return 1.0 + 0.1 * jax.random.normal(k, (c,), jnp.float32)

    def beta(k, c):
        return 0.1 * jax.random.normal(k, (c,), jnp.float32)

    params = {
        "w1": conv_w(ks[0], planes, in_planes, 1),
        "g1": gamma(ks[1], planes), "b1": beta(ks[2], planes),
        "w2": conv_w(ks[3], planes, planes, 3),
        "g2": gamma(ks[4], planes), "b2": beta(ks[5], planes),
        "w3": conv_w(ks[6], out_planes, planes, 1),
        "g3": gamma(ks[7], out_planes), "b3": beta(ks[8], out_planes),
    }
    if stride != 1 or in_planes != out_planes:
        params["wsc"] = conv_w(ks[9], out_planes, in_planes, 1)
        params["gsc"] = gamma(ks[10], out_planes)
        params["bsc"] = beta(ks[11], out_planes)
    return params


def reference_forward(x, params, stride):
    def conv(x, w, s, pad):
        return lax.conv_general_dilated(
            x, w, (s, s), ((pad, pad), (pad, pad)),
            dimension_numbers=("NCHW", "OIHW", "NCHW"),
            precision=lax.Precision.HIGHEST)

    def bn(y, g, b):
        m = jnp.mean(y, axis=(0, 2, 3), keepdims=True)
        v = jnp.mean(jnp.square(y - m), axis=(0, 2, 3), keepdims=True)
        return (y - m) * lax.rsqrt(v + EPS) * g.reshape(1, -1, 1, 1) + b.reshape(1, -1, 1, 1)

    out = jax.nn.relu(bn(conv(x, params["w1"], 1, 0), params["g1"], params["b1"]))
    out = jax.nn.relu(bn(conv(out, params["w2"], stride, 1), params["g2"], params["b2"]))
    out = bn(conv(out, params["w3"], 1, 0), params["g3"], params["b3"])
    if "wsc" in params:
        sc = bn(conv(x, params["wsc"], stride, 0), params["gsc"], params["bsc"])
    else:
        sc = x
    return jax.nn.relu(out + sc)


# ----------------------------------------------------------------------------
if __name__ == "__main__":
    key = jax.random.PRNGKey(0)
    kx1, kx2, kp1, kp2 = jax.random.split(key, 4)

    # Case 1: identity shortcut — Bottleneck(in_planes=16, planes=4, stride=1)
    x1 = jax.random.normal(kx1, (2, 16, 16, 16), jnp.float32)    # NCHW like PyTorch
    params1 = init_params(kp1, in_planes=16, planes=4, stride=1)
    ref1 = reference_forward(x1, params1, 1)

    out1 = bottleneck_forward(x1, params1, stride=1, mxu_dtype=jnp.float32)
    jax.block_until_ready(out1)
    assert out1.shape == (2, 16, 16, 16)
    err1 = float(jnp.max(jnp.abs(out1 - ref1)))
    assert err1 < 2e-2, f"identity/f32 path max err {err1}"

    out1b = bottleneck_forward(x1, params1, stride=1, mxu_dtype=jnp.bfloat16)
    jax.block_until_ready(out1b)
    err1b = float(jnp.max(jnp.abs(out1b - ref1)))
    assert err1b < 1e-1, f"identity/bf16 path max err {err1b}"

    # Case 2: projection shortcut — Bottleneck(in_planes=4, planes=4, stride=2)
    x2 = jax.random.normal(kx2, (2, 4, 16, 16), jnp.float32)
    params2 = init_params(kp2, in_planes=4, planes=4, stride=2)
    ref2 = reference_forward(x2, params2, 2)

    out2 = bottleneck_forward(x2, params2, stride=2, mxu_dtype=jnp.float32)
    jax.block_until_ready(out2)
    assert out2.shape == (2, 16, 8, 8)
    err2 = float(jnp.max(jnp.abs(out2 - ref2)))
    assert err2 < 2e-2, f"projection/f32 path max err {err2}"

    out2b = bottleneck_forward(x2, params2, stride=2, mxu_dtype=jnp.bfloat16)
    jax.block_until_ready(out2b)
    err2b = float(jnp.max(jnp.abs(out2b - ref2)))
    assert err2b < 1e-1, f"projection/bf16 path max err {err2b}"

    print("KERNEL_OK")
</pallas_src>

<mosaic_0001>
module attributes {stable_mosaic.version = 11 : i64} {
  func.func @_matmul_stats_kernel(%arg0: i32, %arg1: memref<256x128xf32, #tpu.memory_space<vmem>>, %arg2: memref<128x128xf32, #tpu.memory_space<vmem>>, %arg3: memref<256x128xf32, #tpu.memory_space<vmem>>, %arg4: memref<1x8x128xf32, #tpu.memory_space<vmem>>, %arg5: memref<1x8x128xf32, #tpu.memory_space<vmem>>) attributes {dimension_semantics = [#tpu.dimension_semantics<parallel>], iteration_bounds = array<i64: 2>, scalar_prefetch = 0 : i64, scratch_operands = 0 : i64, tpu.core_type = #tpu.core_type<tc>, window_params = [{transform_indices = @transform_0, window_bounds = array<i64: 256, 128>}, {pipeline_mode = #tpu.pipeline_mode<synchronous>, transform_indices = @transform_1, window_bounds = array<i64: 128, 128>}, {transform_indices = @transform_2, window_bounds = array<i64: 256, 128>}, {transform_indices = @transform_3, window_bounds = array<i64: 1, 8, 128>}, {transform_indices = @transform_4, window_bounds = array<i64: 1, 8, 128>}]} {
    %c0 = arith.constant 0 : index
    %c0_0 = arith.constant 0 : index
    %0 = vector.load %arg1[%c0, %c0_0] : memref<256x128xf32, #tpu.memory_space<vmem>>, vector<256x128xf32>
    %c0_1 = arith.constant 0 : index
    %c0_2 = arith.constant 0 : index
    %1 = vector.load %arg2[%c0_1, %c0_2] : memref<128x128xf32, #tpu.memory_space<vmem>>, vector<128x128xf32>
    %cst = arith.constant dense<0.000000e+00> : vector<256x128xf32>
    %2 = tpu.matmul %0, %1, %cst {dimension_numbers = #tpu.dot_dimension_numbers<[1], [0], [0], [1], [0, 0, 1, 1], [], []>} : vector<256x128xf32>, vector<128x128xf32>, vector<256x128xf32> -> vector<256x128xf32>
    %c0_3 = arith.constant 0 : index
    %c0_4 = arith.constant 0 : index
    %3 = vector.load %arg3[%c0_3, %c0_4] : memref<256x128xf32, #tpu.memory_space<vmem>>, vector<256x128xf32>
    tpu.vector_store %arg3[%c0_3, %c0_4], %2 {strides = array<i32>} : memref<256x128xf32, #tpu.memory_space<vmem>>, vector<256x128xf32>,
    %c256_i32 = arith.constant 256 : i32
    %4 = arith.muli %arg0, %c256_i32 : i32
    %5 = tpu.iota {dimensions = array<i32: 0>} : vector<256x1xi32>
    %6 = vector.broadcast %4 : i32 to vector<256x1xi32>
    %7 = arith.addi %6, %5 : vector<256x1xi32>
    %c512_i32 = arith.constant 512 : i32
    %8 = vector.broadcast %c512_i32 : i32 to vector<256x1xi32>
    %9 = arith.cmpi slt, %7, %8 : vector<256x1xi32>
    %10 = arith.extui %9 : vector<256x1xi1> to vector<256x1xi32>
    %11 = arith.sitofp %10 : vector<256x1xi32> to vector<256x1xf32>
    %12 = vector.broadcast %11 : vector<256x1xf32> to vector<256x128xf32>
    %13 = arith.mulf %2, %12 : vector<256x128xf32>
    %cst_5 = arith.constant dense<0.000000e+00> : vector<128xf32>
    %14 = vector.multi_reduction <add>, %13, %cst_5 [0] : vector<256x128xf32> to vector<128xf32>
    %15 = arith.mulf %13, %13 : vector<256x128xf32>
    %cst_6 = arith.constant dense<0.000000e+00> : vector<128xf32>
    %16 = vector.multi_reduction <add>, %15, %cst_6 [0] : vector<256x128xf32> to vector<128xf32>
    %17 = vector.shape_cast %14 : vector<128xf32> to vector<1x1x128xf32>
    %18 = vector.shape_cast %17 : vector<1x1x128xf32> to vector<1x1x128xf32>
    %19 = vector.broadcast %18 : vector<1x1x128xf32> to vector<1x8x128xf32>
    %c0_7 = arith.constant 0 : index
    %c0_8 = arith.constant 0 : index
    %c0_9 = arith.constant 0 : index
    %20 = vector.load %arg4[%c0_7, %c0_8, %c0_9] : memref<1x8x128xf32, #tpu.memory_space<vmem>>, vector<1x8x128xf32>
    tpu.vector_store %arg4[%c0_7, %c0_8, %c0_9], %19 {strides = array<i32>} : memref<1x8x128xf32, #tpu.memory_space<vmem>>, vector<1x8x128xf32>,
    %21 = vector.shape_cast %16 : vector<128xf32> to vector<1x1x128xf32>
    %22 = vector.shape_cast %21 : vector<1x1x128xf32> to vector<1x1x128xf32>
    %23 = vector.broadcast %22 : vector<1x1x128xf32> to vector<1x8x128xf32>
    %c0_10 = arith.constant 0 : index
    %c0_11 = arith.constant 0 : index
    %c0_12 = arith.constant 0 : index
    %24 = vector.load %arg5[%c0_10, %c0_11, %c0_12] : memref<1x8x128xf32, #tpu.memory_space<vmem>>, vector<1x8x128xf32>
    tpu.vector_store %arg5[%c0_10, %c0_11, %c0_12], %23 {strides = array<i32>} : memref<1x8x128xf32, #tpu.memory_space<vmem>>, vector<1x8x128xf32>,
    return
  }
  func.func @transform_0(%arg0: i32) -> (i32, i32) {
    %c0_i32 = arith.constant 0 : i32
    %c0_i32_0 = arith.constant 0 : i32
    return %arg0, %c0_i32 : i32, i32
  }
  func.func @transform_1(%arg0: i32) -> (i32, i32) {
    %c0_i32 = arith.constant 0 : i32
    %c0_i32_0 = arith.constant 0 : i32
    %c0_i32_1 = arith.constant 0 : i32
    return %c0_i32, %c0_i32_0 : i32, i32
  }
  func.func @transform_2(%arg0: i32) -> (i32, i32) {
    %c0_i32 = arith.constant 0 : i32
    %c0_i32_0 = arith.constant 0 : i32
    return %arg0, %c0_i32 : i32, i32
  }
  func.func @transform_3(%arg0: i32) -> (i32, i32, i32) {
    %c0_i32 = arith.constant 0 : i32
    %c0_i32_0 = arith.constant 0 : i32
    %c0_i32_1 = arith.constant 0 : i32
    return %arg0, %c0_i32, %c0_i32_0 : i32, i32, i32
  }
  func.func @transform_4(%arg0: i32) -> (i32, i32, i32) {
    %c0_i32 = arith.constant 0 : i32
    %c0_i32_0 = arith.constant 0 : i32
    %c0_i32_1 = arith.constant 0 : i32
    return %arg0, %c0_i32, %c0_i32_0 : i32, i32, i32
  }
}

</mosaic_0001>

<bundles_post_ra>
// kernel: tpu_custom_call.1
= control target key start
LH: loop header
LB: loop body
LE: loop exit
PB: predicated region body
PF: predicated region fallthrough
CT: control target
= control target key end

     0   :  { %10 = vsyncpa [#allocation3], 0  ;;  %s2129_s0 = inlined_call_operand.hbm [shape: f32[512,128], index: 0, kind: input, shape index: {}]   ;;  %s2130_s1 = inlined_call_operand.hbm [shape: f32[128,128], index: 1, kind: input, shape index: {}]   ;;  %s2131_s2 = inlined_call_operand.hbm [shape: f32[512,128], index: 2, kind: output, shape index: {0}]   ;;  %s2132_s3 = inlined_call_operand.hbm [shape: f32[2,8,128], index: 3, kind: output, shape index: {1}]   ;;  %s2133_s4 = inlined_call_operand.hbm [shape: f32[2,8,128], index: 4, kind: output, shape index: {2}]  }
   0x1   :  { %12 = vsyncpa [#allocation3 + $0x1], 0 }
   0x2   :  { %13 = vsyncpa [#allocation6], 0 }
   0x3   :  { %14 = vsyncpa [#allocation4], 0 }
   0x4   :  { %16 = vsyncpa [#allocation4 + $0x1], 0 }
   0x5   :  { %17 = vsyncpa [#allocation9], 0 }
   0x6   :  { %19 = vsyncpa [#allocation9 + $0x1], 0  ;;  %s1583_s15 = smov 0   ;;  %s1585_s16 = smov 0  }
   0x7   :  { %s1587_s17 = smov 0   ;;  %s1589_s18 = smov 0  }
   0x8 LB: > { %s1604_s19 = sadd.s32 4294967295, %s1546_s18   ;;  %s1053_s20 = sadd.s32 4294967294, %s1546_s18   ;;  %s1546_s18 = sphi %s1589_s18, %s2153_s18   ;;  %s1542_s17 = sphi %s1587_s17, %s2152_s17   ;;  %s1538_s16 = sphi %s1585_s16, %s2151_s16   ;;  %s1534_s15 = sphi %s1583_s15, %s2150_s15  }
   0x9   : > { %p45_p0 = scmp.ne.s32.totalorder %s1538_s16, %s1534_s15  ;;  %p2134_p1 = scmp.eq.s32.totalorder %s1604_s19, 0 }
   0xa   : > { %p96_p3 = scmp.eq.s32.totalorder %s1053_s20, 1  ;;  %p1054_p5 = scmp.ge.s32.totalorder %s1546_s18, 1 }
   0xb   : > { %p1615_p4 = por %p2134_p1, %p45_p0  ;;  %p155_p7 = scmp.lt.s32.totalorder %s1546_s18, 3 }
   0xc   : > { %p1620_p6 = por %p96_p3, %p45_p0  ;;  %s1548_s24 = smov [#allocation5]  }
   0xd   : > { %s2137_s21 = scalar_select %p1615_p4, 1, 0 }
   0xe   : > { %s2138_s22 = scalar_select %p1620_p6, 1, 0 }
   0xf   : > { %p1625_p8 = pnand %p1054_p5, %p155_p7  ;;  %s167_s25 = sshll.u32 %s1548_s24, 4  ;;  %s1629_s25 = int_to_ptr.vmem [resolvable:$true] %s167_s25 }
  0x10   : > { %s1641_s27 = sadd.s32 1, %s1546_s18   ;;  %s32_s28 = sadd.s32 1, %s1542_s17 }
  0x11   : > { %s2139_s23 = scalar_select %p1625_p8, 1, 0 }
  0x12   : > { %p1298_p9 = pneg %p1625_p8  ;;  %s29_s29 = ssub.s32 %s1546_s18, %s1641_s27 }
  0x13   : > { %s1358_s6 = scalar_lea.hbm %s2130_s1, 2048 }
  0x14   : > { %p1636_p11 = pnand %p1298_p9, %p2134_p1  ;;  %p1359_p12 = scmp.ne.s32.totalorder %s2130_s1, %s1358_s6 }
  0x15   : > { %p1365_p5 = scmp.lt.u32.totalorder %s1358_s6, %s2130_s1 }
  0x16   : > { %p1360_p13 = pneg %p1636_p11 }
  0x18   : > { %p1361_p0 = pnand %p1360_p13, %p1359_p12 }
  0x1a   : > { %p1362_p3 = pneg %p1361_p0 }
  0x1c   : > { %p1367_p7 = pnand %p1365_p5, %p1362_p3 }
  0x1e   : > { %1370 = shalt.err (!%p1367_p7)
}
  0x1f   : > { %s1371_s11 = scalar_lea.vmem %s1629_s25, 2048  ;;  %p1379_p2 = scmp.lt.s32.totalorder %s1629_s25, %s1629_s25 }
  0x20   : > { %p1372_p9 = scmp.ne.s32.totalorder %s1629_s25, %s1371_s11  ;;  %p1380_p6 = scmp.lt.s32.totalorder %s1371_s11, %s1371_s11 }
  0x22   : > { %p1374_p10 = pnand %p1372_p9, %p1360_p13  ;;  %p1381_p4 = por %p1380_p6, %p1379_p2 }
  0x24   : > { %p1375_p1 = pneg %p1374_p10 }
  0x26   : > { %p1382_p8 = pnand %p1381_p4, %p1375_p1 }
  0x28   : > { %1385 = shalt.err (!%p1382_p8)
}
  0x29   : > { %s1549_s12 = smov 128   ;;  %s1550_s13 = smov 8  }
  0x2a   : > { %1301 = dma.hbm_to_vmem [thread:$0]  (!%p1636_p11), %s2130_s1, 2048, %s1629_s25, [#allocation6], %s1549_s12, %s1549_s12, %s1550_s13  }
  0x2b   : > { %p30_p1 = scmp.eq.s32.totalorder %s29_s29, 0  ;;  %p39_p2 = scmp.ne.s32.totalorder %s1542_s17, %s1538_s16 }
  0x2c   : > { %p40_p4 = scmp.eq.s32.totalorder %s1546_s18, 0  ;;  %p1317_p6 = scmp.lt.s32.totalorder %s1546_s18, 2 }
  0x2d   : > { %s1675_s30 = scalar_select %p30_p1, %s1542_s17, %s32_s28  }
  0x2e   : > { %p41_p8 = por %p40_p4, %p39_p2  ;;  %p2141_p10 = scmp.eq.s32.totalorder %s1604_s19, 1 }
  0x2f   : > { %s181_s26 = sand.u32 1, %s1542_s17   ;;  %s1108_s6 = sshll.u32 %s1546_s18, 12 }
  0x30   : > { %p1679_p12 = por %p2141_p10, %p39_p2  ;;  %s1057_s7 = sshll.u32 %s181_s26, 8 }
  0x31   : > { %s1688_s10 = scalar_lea.hbm %s2129_s0, %s1108_s6  ;;  %s185_s25 = scalar_lea.vmem [#allocation2], %s1057_s7 }
  0x32   : > { %s192_s28 = sshll.u32 %s185_s25, 4  ;;  %p1690_p11 = pnand %p1317_p6, %p41_p8  ;;  %s1694_s28 = int_to_ptr.vmem [resolvable:$true] %s192_s28 }
  0x33   : > { %s1696_s11 = scalar_lea.sflag [#allocation3], %s181_s26  ;;  %s1386_s14 = scalar_lea.hbm %s1688_s10, 4096 }
  0x34   : > { %p1387_p13 = scmp.ne.s32.totalorder %s1688_s10, %s1386_s14  ;;  %p1388_p0 = pneg %p1690_p11 }
  0x35   : > { %s1391_s7 = scalar_lea.hbm %s2129_s0, 8192  ;;  %p1392_p7 = scmp.lt.u32.totalorder %s1688_s10, %s2129_s0 }
  0x36   : > { %p1389_p3 = pnand %p1388_p0, %p1387_p13  ;;  %p1393_p9 = scmp.lt.u32.totalorder %s1391_s7, %s1386_s14 }
  0x37   : > { %p1395_p2 = scmp.lt.u32.totalorder %s1386_s14, %s1688_s10 }
  0x38   : > { %p1390_p5 = pneg %p1389_p3  ;;  %p1394_p1 = por %p1393_p9, %p1392_p7 }
  0x3a   : > { %p1396_p4 = por %p1395_p2, %p1394_p1 }
  0x3c   : > { %p1397_p6 = pnand %p1396_p4, %p1390_p5 }
  0x3e   : > { %1400 = shalt.err (!%p1397_p6)
}
  0x3f   : > { %s1401_s26 = scalar_lea.vmem %s1694_s28, 4096  ;;  %s1551_s25 = smov [#allocation2]  }
  0x40   : > { %p1402_p8 = scmp.ne.s32.totalorder %s1694_s28, %s1401_s26  ;;  %s1406_s24 = sshll.u32 %s1551_s25, 4  ;;  %s1407_s24 = int_to_ptr.vmem [resolvable:$false] %s1406_s24 }
  0x41   : > { %s1408_s6 = scalar_lea.vmem %s1407_s24, 8192  ;;  %p1409_p3 = scmp.lt.s32.totalorder %s1694_s28, %s1407_s24 }
  0x42   : > { %p1404_p10 = pnand %p1402_p8, %p1388_p0  ;;  %p1410_p7 = scmp.lt.s32.totalorder %s1408_s6, %s1401_s26 }
  0x44   : > { %p1405_p13 = pneg %p1404_p10  ;;  %p1411_p9 = por %p1410_p7, %p1409_p3 }
  0x46   : > { %p1412_p1 = pnand %p1411_p9, %p1405_p13 }
  0x48   : > { %1415 = shalt.err (!%p1412_p1)
}
  0x49   : > { %1305 = dma.hbm_to_vmem [thread:$0]  (!%p1690_p11), %s1688_s10, 4096, %s1694_s28, %s1696_s11, %s1549_s12, %s1549_s12, %s1550_s13  }
  0x4a   : > { %p2144_p0 = scmp.ne.s32.totalorder %s2139_s23, 0 }
  0x4b   : > { %s1730_s14 = sand.u32 (!%p2144_p0), 1, %s1538_s16   ;;  %p2145_p5 = scmp.ne.s32.totalorder (!%p2144_p0), %s2137_s21, 0 }
  0x4c   : > { %204 = sbr.rel (%p2144_p0) target bundleno = 460 (0x1cc), region = 28  ;;  %s1061_s7 = sshll.u32 (!%p2144_p0), %s1730_s14, 8 }
  0x4d   : > { %s207_s8 = scalar_lea.sflag (!%p2144_p0), [#allocation3], %s1730_s14  ;;  %s1736_s29 = scalar_lea.vmem (!%p2144_p0), [#allocation2], %s1061_s7 }
  0x53   : > { %1517 = dma.done.wait (%p2145_p5), %s207_s8, 4096  }
  0x54   : > { %1519 = vsyncadd (%p2145_p5), %s207_s8, 4294963200  ;;  %p2146_p11 = scmp.eq.s32.totalorder %s1604_s19, 0 }
  0x56   : > { %1521 = dma.done.wait (%p2146_p11), [#allocation6], 2048   ;;  %p2147_p2 = pmov %p2146_p11 }
  0x57   : > { %v283_v0 = vld [vmem:[#allocation5] sm:$0xff]  ;;  %v284_v1 = vld [vmem:[#allocation5 + $0x8] sm:$0xff]  ;;  %v285_v2 = vld [vmem:[#allocation5 + $0x10] sm:$0xff]  ;;  %v557_v56 = vlaneseq  ;;  %s1066_s21 = sshll.u32 %s1604_s19, 8  ;;  %s1807_s23 = scalar_lea.vmem [#allocation7], %s1061_s7 }
  0x58   : > { %1523 = vsyncadd (%p2147_p2), [#allocation6], 4294965248  ;;  %v1238_v3 = vpack.c.bf16 %v284_v1, %v283_v0  ;;  %v286_v4 = vld [vmem:[#allocation5 + $0x18] sm:$0xff]  ;;  %v287_v6 = vld [vmem:[#allocation5 + $0x20] sm:$0xff]  ;;  %v1782_v59 = vstv %s1066_s21  ;;  %s1109_s12 = sshll.u32 %s1604_s19, 12  ;;  %s883_s13 = sshll.u32 %s1807_s23, 4  ;;  %s1946_s13 = int_to_ptr.vmem [resolvable:$true] %s883_s13 }
  0x59   : > { %v1242_v5 = vpack.c.bf16 %v286_v4, %v285_v2  ;;  %v288_v7 = vld [vmem:[#allocation5 + $0x28] sm:$0xff]  ;;  %v251_v9 = vld [vmem:[%s1736_s29] sm:$0xff]  ;;  %v289_v10 = vld [vmem:[#allocation5 + $0x30] sm:$0xff]  ;;  %v1778_v57 = vshrl.u32 %v557_v56, 7  ;;  %s1944_s11 = scalar_lea.hbm %s2131_s2, %s1109_s12  ;;  %s860_s9 = scalar_lea.sflag [#allocation4], %s1730_s14 }
  0x5a   : > { %1239 = vmatprep.subr.bf16.mxu0 %v1238_v3  ;;  %1270 = vmatprep.subr.bf16.mxu1 %v1238_v3  ;;  %v1246_v8 = vpack.c.bf16 %v288_v7, %v287_v6  ;;  %v290_v11 = vld [vmem:[#allocation5 + $0x38] sm:$0xff]  ;;  %v291_v13 = vld [vmem:[#allocation5 + $0x40] sm:$0xff]  ;;  %v292_v14 = vld [vmem:[#allocation5 + $0x48] sm:$0xff]  ;;  %v1552_v6 = vmov 0.0   ;;  %s1416_s26 = scalar_lea.vmem %s1946_s13, 4096  ;;  %s1553_s25 = smov [#allocation7]  }
  0x5b   : > { %1241 = vmatpush3.bf16.msra.mxu0 %v1238_v3  ;;  %1278 = vmatpush3.bf16.msra.mxu1 %v1238_v3  ;;  %v1250_v12 = vpack.c.bf16 %v290_v11, %v289_v10  ;;  %v267_v15 = vld [vmem:[%s1736_s29 + $0x80] sm:$0xff]  ;;  %v1254_v16 = vpack.c.bf16 %v292_v14, %v291_v13  ;;  %v293_v17 = vld [vmem:[#allocation5 + $0x50] sm:$0xff]  ;;  %v294_v18 = vld [vmem:[#allocation5 + $0x58] sm:$0xff]  ;;  %v559_v58 = vadd.s32 8, %v1778_v57  ;;  %v561_v61 = vadd.s32 24, %v1778_v57  ;;  %p1417_p4 = scmp.ne.s32.totalorder %s1946_s13, %s1416_s26  ;;  %s1420_s24 = sshll.u32 %s1553_s25, 4  ;;  %s1421_s24 = int_to_ptr.vmem [resolvable:$false] %s1420_s24 }
  0x5c   : > { %1243 = vmatprep.subr.bf16.mxu0 %v1242_v5  ;;  %1271 = vmatprep.subr.bf16.mxu1 %v1242_v5  ;;  %v1258_v19 = vpack.c.bf16 %v294_v18, %v293_v17  ;;  %v295_v20 = vld [vmem:[#allocation5 + $0x60] sm:$0xff]  ;;  %v296_v21 = vld [vmem:[#allocation5 + $0x68] sm:$0xff]  ;;  %v297_v23 = vld [vmem:[#allocation5 + $0x70] sm:$0xff]  ;;  %v560_v62 = vadd.s32 16, %v1778_v57  ;;  %v591_v63 = vadd.s32 %v1782_v59, %v1778_v57  ;;  %v563_v1 = vadd.s32 40, %v1778_v57  ;;  %s1422_s6 = scalar_lea.vmem %s1421_s24, 8192  ;;  %p1423_p10 = scmp.lt.s32.totalorder %s1946_s13, %s1421_s24 }
  0x5d   : > { %1190 = vmatprep.mubr.f32.mxu0 %v251_v9  ;;  %1214 = vmatprep.mubr.f32.mxu1 %v267_v15  ;;  %v1262_v22 = vpack.c.bf16 %v296_v21, %v295_v20  ;;  %v298_v24 = vld [vmem:[#allocation5 + $0x78] sm:$0xff]  ;;  %v252_v26 = vld [vmem:[%s1736_s29 + $0x8] sm:$0xff]  ;;  %v253_v28 = vld [vmem:[%s1736_s29 + $0x10] sm:$0xff]  ;;  %v592_v60 = vadd.s32 %v1782_v59, %v559_v58  ;;  %v594_v0 = vadd.s32 %v1782_v59, %v561_v61  ;;  %v562_v3 = vadd.s32 32, %v1778_v57  ;;  %p1418_p6 = pnand %p1417_p4, %p1679_p12  ;;  %p1424_p13 = scmp.lt.s32.totalorder %s1422_s6, %s1416_s26 }
  0x5e   : > { %v1266_v25 = vpack.c.bf16 %v298_v24, %v297_v23  ;;  %v268_v27 = vld [vmem:[%s1736_s29 + $0x88] sm:$0xff]  ;;  %v269_v29 = vld [vmem:[%s1736_s29 + $0x90] sm:$0xff]  ;;  %v254_v30 = vld [vmem:[%s1736_s29 + $0x18] sm:$0xff]  ;;  %v593_v2 = vadd.s32 %v1782_v59, %v560_v62  ;;  %v565_v4 = vadd.s32 56, %v1778_v57  ;;  %vm623_vm1 = vcmp.lt.s32.totalorder %v591_v63, 512 }
  0x5f   : > { %1245 = vmatpush3.bf16.msra.mxu0 %v1242_v5  ;;  %1279 = vmatpush3.bf16.msra.mxu1 %v1242_v5  ;;  %v270_v31 = vld [vmem:[%s1736_s29 + $0x98] sm:$0xff]  ;;  %v255_v32 = vld [vmem:[%s1736_s29 + $0x20] sm:$0xff]  ;;  %v256_v34 = vld [vmem:[%s1736_s29 + $0x28] sm:$0xff]  ;;  %vm624_vm0 = vcmp.lt.s32.totalorder %v592_v60, 512  ;;  %v564_v5 = vadd.s32 48, %v1778_v57  ;;  %vm626_vm2 = vcmp.lt.s32.totalorder %v594_v0, 512  ;;  %v595_v11 = vadd.s32 %v1782_v59, %v562_v3  ;;  %p1419_p8 = pneg %p1418_p6  ;;  %p1425_p3 = por %p1424_p13, %p1423_p10 }
  0x60   : > { %1247 = vmatprep.subr.bf16.mxu0 %v1246_v8  ;;  %1272 = vmatprep.subr.bf16.mxu1 %v1246_v8  ;;  %v271_v33 = vld [vmem:[%s1736_s29 + $0xa0] sm:$0xff]  ;;  %v272_v35 = vld [vmem:[%s1736_s29 + $0xa8] sm:$0xff]  ;;  %v257_v36 = vld [vmem:[%s1736_s29 + $0x30] sm:$0xff]  ;;  %v1068_v7 = vsel %vm624_vm0, 1.0, %v1552_v6  ;;  %v567_v9 = vadd.s32 72, %v1778_v57  ;;  %v1067_v10 = vsel %vm623_vm1, 1.0, %v1552_v6 }
  0x61   : > { %v273_v37 = vld [vmem:[%s1736_s29 + $0xb0] sm:$0xff]  ;;  %v258_v38 = vld [vmem:[%s1736_s29 + $0x38] sm:$0xff]  ;;  %v259_v40 = vld [vmem:[%s1736_s29 + $0x40] sm:$0xff]  ;;  %vm625_vm3 = vcmp.lt.s32.totalorder %v593_v2, 512  ;;  %v597_v14 = vadd.s32 %v1782_v59, %v564_v5  ;;  %v566_v15 = vadd.s32 64, %v1778_v57  ;;  %v569_v20 = vadd.s32 88, %v1778_v57  ;;  %p1426_p7 = pnand %p1425_p3, %p1419_p8 }
  0x62   : > { %v274_v39 = vld [vmem:[%s1736_s29 + $0xb8] sm:$0xff]  ;;  %v275_v41 = vld [vmem:[%s1736_s29 + $0xc0] sm:$0xff]  ;;  %v260_v42 = vld [vmem:[%s1736_s29 + $0x48] sm:$0xff]  ;;  %v1069_v23 = vsel %vm625_vm3, 1.0, %v1552_v6  ;;  %v600_v24 = vadd.s32 %v1782_v59, %v567_v9  ;;  %vm627_vm5 = vcmp.lt.s32.totalorder %v595_v11, 512  ;;  %v573_v60 = vadd.s32 120, %v1778_v57 }
  0x63   : > { %1249 = vmatpush3.bf16.msra.mxu0 %v1246_v8  ;;  %1280 = vmatpush3.bf16.msra.mxu1 %v1246_v8  ;;  %v276_v43 = vld [vmem:[%s1736_s29 + $0xc8] sm:$0xff]  ;;  %v261_v44 = vld [vmem:[%s1736_s29 + $0x50] sm:$0xff]  ;;  %v262_v46 = vld [vmem:[%s1736_s29 + $0x58] sm:$0xff]  ;;  %v596_v8 = vadd.s32 %v1782_v59, %v563_v1  ;;  %vm629_vm7 = vcmp.lt.s32.totalorder %v597_v14, 512  ;;  %v572_v61 = vadd.s32 112, %v1778_v57  ;;  %v574_v9 = vadd.s32 128, %v1778_v57 }
  0x64   : > { %1251 = vmatprep.subr.bf16.mxu0 %v1250_v12  ;;  %1273 = vmatprep.subr.bf16.mxu1 %v1250_v12  ;;  %v277_v45 = vld [vmem:[%s1736_s29 + $0xd0] sm:$0xff]  ;;  %v278_v47 = vld [vmem:[%s1736_s29 + $0xd8] sm:$0xff]  ;;  %v263_v48 = vld [vmem:[%s1736_s29 + $0x60] sm:$0xff]  ;;  %vm632_vm8 = vcmp.lt.s32.totalorder %v600_v24, 512 }
  0x65   : > { %v279_v49 = vld [vmem:[%s1736_s29 + $0xe0] sm:$0xff]  ;;  %v264_v50 = vld [vmem:[%s1736_s29 + $0x68] sm:$0xff]  ;;  %v265_v52 = vld [vmem:[%s1736_s29 + $0x70] sm:$0xff]  ;;  %vm628_vm4 = vcmp.lt.s32.totalorder %v596_v8, 512 }
  0x66   : > { %v280_v51 = vld [vmem:[%s1736_s29 + $0xe8] sm:$0xff]  ;;  %v281_v53 = vld [vmem:[%s1736_s29 + $0xf0] sm:$0xff]  ;;  %v266_v54 = vld [vmem:[%s1736_s29 + $0x78] sm:$0xff] }
  0x67   : > { %1253 = vmatpush3.bf16.msra.mxu0 %v1250_v12  ;;  %1281 = vmatpush3.bf16.msra.mxu1 %v1250_v12  ;;  %v282_v55 = vld [vmem:[%s1736_s29 + $0xf8] sm:$0xff]  ;;  %v598_v12 = vadd.s32 %v1782_v59, %v565_v4 }
  0x68   : > { %1255 = vmatprep.subr.bf16.mxu0 %v1254_v16  ;;  %1274 = vmatprep.subr.bf16.mxu1 %v1254_v16 }
  0x69   : > { %vm630_vm6 = vcmp.lt.s32.totalorder %v598_v12, 512 }
  0x6b   : > { %1257 = vmatpush3.bf16.msra.mxu0 %v1254_v16  ;;  %1282 = vmatpush3.bf16.msra.mxu1 %v1254_v16 }
  0x6c   : > { %1259 = vmatprep.subr.bf16.mxu0 %v1258_v19  ;;  %1275 = vmatprep.subr.bf16.mxu1 %v1258_v19 }
  0x6f   : > { %1261 = vmatpush3.bf16.msra.mxu0 %v1258_v19  ;;  %1283 = vmatpush3.bf16.msra.mxu1 %v1258_v19  ;;  %v1070_v19 = vsel %vm626_vm2, 1.0, %v1552_v6 }
  0x70   : > { %1263 = vmatprep.subr.bf16.mxu0 %v1262_v22  ;;  %1276 = vmatprep.subr.bf16.mxu1 %v1262_v22 }
  0x73   : > { %1265 = vmatpush3.bf16.msra.mxu0 %v1262_v22  ;;  %1284 = vmatpush3.bf16.msra.mxu1 %v1262_v22 }
  0x74   : > { %1267 = vmatprep.subr.bf16.mxu0 %v1266_v25  ;;  %1277 = vmatprep.subr.bf16.mxu1 %v1266_v25 }
  0x77   : > { %1269 = vmatpush3.bf16.msra.mxu0 %v1266_v25  ;;  %1285 = vmatpush3.bf16.msra.mxu1 %v1266_v25 }
  0x7a   : > { %1191 = vmatmul.mubr.f32.vlgmr.msra.gmra.mrb[0].mxu0 %v252_v26  ;;  %1215 = vmatmul.mubr.f32.vlgmr.msra.gmra.mrb[0].mxu1 %v268_v27  ;;  %v568_v26 = vadd.s32 80, %v1778_v57 }
  0x7b   : > { %1193 = vmatprep.mubr.f32.mxu0 %v253_v28  ;;  %1217 = vmatprep.mubr.f32.mxu1 %v269_v29 }
  0x7e   : > { %1194 = vmatmul.mubr.f32.gmra.mrb[2].mxu0 %v254_v30  ;;  %1218 = vmatmul.mubr.f32.gmra.mrb[2].mxu1 %v270_v31  ;;  %v599_v30 = vadd.s32 %v1782_v59, %v566_v15 }
  0x7f   : > { %1196 = vmatprep.mubr.f32.mxu0 %v255_v32  ;;  %1220 = vmatprep.mubr.f32.mxu1 %v271_v33  ;;  %v1072_v33 = vsel %vm628_vm4, 1.0, %v1552_v6 }
  0x80   : > { %vm631_vm9 = vcmp.lt.s32.totalorder %v599_v30, 512 }
  0x81   : > { %v1075_v58 = vsel %vm631_vm9, 1.0, %v1552_v6 }
  0x82   : > { %1197 = vmatmul.mubr.f32.gmra.mrb[4].mxu0 %v256_v34  ;;  %1221 = vmatmul.mubr.f32.gmra.mrb[4].mxu1 %v272_v35  ;;  %v602_v34 = vadd.s32 %v1782_v59, %v569_v20 }
  0x83   : > { %1199 = vmatprep.mubr.f32.mxu0 %v257_v36  ;;  %1223 = vmatprep.mubr.f32.mxu1 %v273_v37 }
  0x84   : > { %vm634_vm10 = vcmp.lt.s32.totalorder %v602_v34, 512 }
  0x86   : > { %1200 = vmatmul.mubr.f32.gmra.mrb[6].mxu0 %v258_v38  ;;  %1224 = vmatmul.mubr.f32.gmra.mrb[6].mxu1 %v274_v39  ;;  %v1071_v39 = vsel %vm627_vm5, 1.0, %v1552_v6 }
  0x87   : > { %1202 = vmatprep.mubr.f32.mxu0 %v259_v40  ;;  %1226 = vmatprep.mubr.f32.mxu1 %v275_v41  ;;  %v1074_v40 = vsel %vm630_vm6, 1.0, %v1552_v6  ;;  %v1073_v41 = vsel %vm629_vm7, 1.0, %v1552_v6 }
  0x8a   : > { %1203 = vmatmul.mubr.f32.gmra.mrb[8].mxu0 %v260_v42  ;;  %1227 = vmatmul.mubr.f32.gmra.mrb[8].mxu1 %v276_v43  ;;  %v601_v42 = vadd.s32 %v1782_v59, %v568_v26 }
  0x8b   : > { %1205 = vmatprep.mubr.f32.mxu0 %v261_v44  ;;  %1229 = vmatprep.mubr.f32.mxu1 %v277_v45 }
  0x8c   : > { %vm633_vm11 = vcmp.lt.s32.totalorder %v601_v42, 512 }
  0x8d   : > { %v1077_v15 = vsel %vm633_vm11, 1.0, %v1552_v6 }
  0x8e   : > { %1206 = vmatmul.mubr.f32.gmra.mrb[10].mxu0 %v262_v46  ;;  %1230 = vmatmul.mubr.f32.gmra.mrb[10].mxu1 %v278_v47  ;;  %v571_v46 = vadd.s32 104, %v1778_v57 }
  0x8f   : > { %1208 = vmatprep.mubr.f32.mxu0 %v263_v48  ;;  %1232 = vmatprep.mubr.f32.mxu1 %v279_v49 }
  0x90   : > { %v604_v2 = vadd.s32 %v1782_v59, %v571_v46 }
  0x92   : > { %1209 = vmatmul.mubr.f32.gmra.mrb[12].mxu0 %v264_v50  ;;  %1233 = vmatmul.mubr.f32.gmra.mrb[12].mxu1 %v280_v51  ;;  %v1076_v50 = vsel %vm632_vm8, 1.0, %v1552_v6  ;;  %v570_v51 = vadd.s32 96, %v1778_v57  ;;  %vm636_vm12 = vcmp.lt.s32.totalorder %v604_v2, 512 }
  0x93   : > { %1211 = vmatprep.mubr.f32.mxu0 %v265_v52  ;;  %1235 = vmatprep.mubr.f32.mxu1 %v281_v53 }
  0x94   : > { %v603_v8 = vadd.s32 %v1782_v59, %v570_v51 }
  0x96   : > { %1212 = vmatmul.mubr.f32.gmra.mrb[14].mxu0 %v266_v54  ;;  %1236 = vmatmul.mubr.f32.gmra.mrb[14].mxu1 %v282_v55  ;;  %vm635_vm13 = vcmp.lt.s32.totalorder %v603_v8, 512  ;;  %v579_v8 = vadd.s32 168, %v1778_v57 }
 0x14d   : > { %v1192_v13 = vpop.f32.mrb[0].mxu0  ;;  %v1803_v16 = vpop.f32.mrb[0].mxu1 }
 0x14e   : > { %525 = vst [vmem:[%s1807_s23 + $0x8] sm:$0xff] %v1192_v13  ;;  %v720_v17 = vmul.f32 %v1192_v13, %v1068_v7  ;;  %v365_v18 = vpop.f32.mrb[1].mxu0  ;;  %541 = vst [vmem:[%s1807_s23 + $0x88] sm:$0xff] %v1803_v16  ;;  %v1814_v21 = vpop.f32.mrb[1].mxu1  ;;  %v1078_v7 = vsel %vm634_vm10, 1.0, %v1552_v6 }
 0x14f   : > { %524 = vst [vmem:[%s1807_s23] sm:$0xff] %v365_v18  ;;  %v719_v22 = vmul.f32 %v1067_v10, %v365_v18  ;;  %540 = vst [vmem:[%s1807_s23 + $0x80] sm:$0xff] %v1814_v21  ;;  %v605_v18 = vadd.s32 %v1782_v59, %v572_v61 }
 0x150   : > { %v789_v25 = vmul.f32 %v720_v17, %v720_v17 }
 0x151   : > { %v751_v27 = vadd.f32 %v720_v17, %v719_v22  ;;  %v788_v28 = vmul.f32 %v719_v22, %v719_v22  ;;  %v1195_v29 = vpop.f32.mrb[2].mxu0  ;;  %v1824_v31 = vpop.f32.mrb[2].mxu1  ;;  %v606_v17 = vadd.s32 %v1782_v59, %v573_v60  ;;  %vm637_vm15 = vcmp.lt.s32.totalorder %v605_v18, 512 }
 0x152   : > { %527 = vst [vmem:[%s1807_s23 + $0x18] sm:$0xff] %v1195_v29  ;;  %v375_v32 = vpop.f32.mrb[3].mxu0  ;;  %543 = vst [vmem:[%s1807_s23 + $0x98] sm:$0xff] %v1824_v31  ;;  %v1831_v35 = vpop.f32.mrb[3].mxu1  ;;  %v722_v37 = vmul.f32 %v1195_v29, %v1070_v19  ;;  %v575_v19 = vadd.s32 136, %v1778_v57  ;;  %v576_v29 = vadd.s32 144, %v1778_v57 }
 0x153   : > { %v820_v36 = vadd.f32 %v789_v25, %v788_v28  ;;  %526 = vst [vmem:[%s1807_s23 + $0x10] sm:$0xff] %v375_v32  ;;  %v721_v38 = vmul.f32 %v1069_v23, %v375_v32  ;;  %542 = vst [vmem:[%s1807_s23 + $0x90] sm:$0xff] %v1831_v35  ;;  %v607_v28 = vadd.s32 %v1782_v59, %v574_v9  ;;  %vm638_vm14 = vcmp.lt.s32.totalorder %v606_v17, 512 }
 0x154   : > { %v791_v53 = vmul.f32 %v722_v37, %v722_v37  ;;  %v578_v60 = vadd.s32 160, %v1778_v57  ;;  %v581_v18 = vadd.s32 184, %v1778_v57 }
 0x155   : > { %v752_v43 = vadd.f32 %v751_v27, %v721_v38  ;;  %v790_v44 = vmul.f32 %v721_v38, %v721_v38  ;;  %v1198_v45 = vpop.f32.mrb[4].mxu0  ;;  %v1844_v47 = vpop.f32.mrb[4].mxu1  ;;  %v608_v38 = vadd.s32 %v1782_v59, %v575_v19  ;;  %vm639_vm0 = vcmp.lt.s32.totalorder %v607_v28, 512 }
 0x156   : > { %529 = vst [vmem:[%s1807_s23 + $0x28] sm:$0xff] %v1198_v45  ;;  %v724_v48 = vmul.f32 %v1198_v45, %v1072_v33  ;;  %v385_v49 = vpop.f32.mrb[5].mxu0  ;;  %545 = vst [vmem:[%s1807_s23 + $0xa8] sm:$0xff] %v1844_v47  ;;  %v1851_v52 = vpop.f32.mrb[5].mxu1  ;;  %v1937_v17 = vadd.s32 %v1782_v59, %v578_v60  ;;  %v580_v19 = vadd.s32 176, %v1778_v57 }
 0x157   : > { %v821_v54 = vadd.f32 %v820_v36, %v790_v44  ;;  %528 = vst [vmem:[%s1807_s23 + $0x20] sm:$0xff] %v385_v49  ;;  %v723_v55 = vmul.f32 %v1071_v39, %v385_v49  ;;  %v753_v56 = vadd.f32 %v752_v43, %v722_v37  ;;  %544 = vst [vmem:[%s1807_s23 + $0xa0] sm:$0xff] %v1851_v52  ;;  %v1080_v37 = vsel %vm636_vm12, 1.0, %v1552_v6 }
 0x158   : > { %v793_v4 = vmul.f32 %v724_v48, %v724_v48  ;;  %v577_v43 = vadd.s32 152, %v1778_v57  ;;  %v609_v49 = vadd.s32 %v1782_v59, %v576_v29  ;;  %vm640_vm1 = vcmp.lt.s32.totalorder %v608_v38, 512 }
 0x159   : > { %v754_v62 = vadd.f32 %v753_v56, %v723_v55  ;;  %v792_v63 = vmul.f32 %v723_v55, %v723_v55  ;;  %v822_v0 = vadd.f32 %v821_v54, %v791_v53  ;;  %v1201_v1 = vpop.f32.mrb[6].mxu0  ;;  %v1861_v3 = vpop.f32.mrb[6].mxu1  ;;  %v1082_v56 = vsel %vm638_vm14, 1.0, %v1552_v6 }
 0x15a   : > { %531 = vst [vmem:[%s1807_s23 + $0x38] sm:$0xff] %v1201_v1  ;;  %v395_v5 = vpop.f32.mrb[7].mxu0  ;;  %547 = vst [vmem:[%s1807_s23 + $0xb8] sm:$0xff] %v1861_v3  ;;  %v1870_v10 = vpop.f32.mrb[7].mxu1  ;;  %v726_v12 = vmul.f32 %v1201_v1, %v1074_v40  ;;  %v1915_v1 = vadd.s32 %v1782_v59, %v577_v43  ;;  %vm641_vm2 = vcmp.lt.s32.totalorder %v609_v49, 512  ;;  %vm643_vm4 = vcmp.lt.s32.totalorder %v1937_v17, 512 }
 0x15b   : > { %v823_v11 = vadd.f32 %v822_v0, %v792_v63  ;;  %530 = vst [vmem:[%s1807_s23 + $0x30] sm:$0xff] %v395_v5  ;;  %v725_v13 = vmul.f32 %v1073_v41, %v395_v5  ;;  %v755_v14 = vadd.f32 %v754_v62, %v724_v48  ;;  %546 = vst [vmem:[%s1807_s23 + $0xb0] sm:$0xff] %v1870_v10  ;;  %v1079_v48 = vsel %vm635_vm13, 1.0, %v1552_v6 }
 0x15c   : > { %v795_v32 = vmul.f32 %v726_v12, %v726_v12  ;;  %vm642_vm3 = vcmp.lt.s32.totalorder %v1915_v1, 512 }
 0x15d   : > { %v756_v20 = vadd.f32 %v755_v14, %v725_v13  ;;  %v794_v22 = vmul.f32 %v725_v13, %v725_v13  ;;  %v824_v23 = vadd.f32 %v823_v11, %v793_v4  ;;  %v1204_v24 = vpop.f32.mrb[8].mxu0  ;;  %v1880_v25 = vpop.f32.mrb[8].mxu1 }
 0x15e   : > { %533 = vst [vmem:[%s1807_s23 + $0x48] sm:$0xff] %v1204_v24  ;;  %v728_v26 = vmul.f32 %v1204_v24, %v1076_v50  ;;  %v405_v27 = vpop.f32.mrb[9].mxu0  ;;  %549 = vst [vmem:[%s1807_s23 + $0xc8] sm:$0xff] %v1880_v25  ;;  %v1887_v30 = vpop.f32.mrb[9].mxu1 }
 0x15f   : > { %v825_v33 = vadd.f32 %v824_v23, %v794_v22  ;;  %532 = vst [vmem:[%s1807_s23 + $0x40] sm:$0xff] %v405_v27  ;;  %v727_v34 = vmul.f32 %v1075_v58, %v405_v27  ;;  %v757_v36 = vadd.f32 %v756_v20, %v726_v12  ;;  %548 = vst [vmem:[%s1807_s23 + $0xc0] sm:$0xff] %v1887_v30  ;;  %v1081_v58 = vsel %vm637_vm15, 1.0, %v1552_v6 }
 0x160   : > { %v797_v45 = vmul.f32 %v728_v26, %v728_v26 }
 0x161   : > { %v758_v39 = vadd.f32 %v757_v36, %v727_v34  ;;  %v796_v40 = vmul.f32 %v727_v34, %v727_v34  ;;  %v826_v41 = vadd.f32 %v825_v33, %v795_v32  ;;  %v1207_v42 = vpop.f32.mrb[10].mxu0  ;;  %v1896_v44 = vpop.f32.mrb[10].mxu1  ;;  %v1085_v32 = vsel %vm641_vm2, 1.0, %v1552_v6 }
 0x162   : > { %535 = vst [vmem:[%s1807_s23 + $0x58] sm:$0xff] %v1207_v42  ;;  %v415_v46 = vpop.f32.mrb[11].mxu0  ;;  %551 = vst [vmem:[%s1807_s23 + $0xd8] sm:$0xff] %v1896_v44  ;;  %v1904_v50 = vpop.f32.mrb[11].mxu1  ;;  %v730_v53 = vmul.f32 %v1207_v42, %v1078_v7  ;;  %v1083_v7 = vsel %vm639_vm0, 1.0, %v1552_v6  ;;  %v1956_v33 = vadd.s32 %v1782_v59, %v579_v8 }
 0x163   : > { %v827_v51 = vadd.f32 %v826_v41, %v796_v40  ;;  %534 = vst [vmem:[%s1807_s23 + $0x50] sm:$0xff] %v415_v46  ;;  %v729_v54 = vmul.f32 %v1077_v15, %v415_v46  ;;  %v759_v55 = vadd.f32 %v758_v39, %v728_v26  ;;  %550 = vst [vmem:[%s1807_s23 + $0xd0] sm:$0xff] %v1904_v50  ;;  %v1934_v15 = vsel %vm640_vm1, 1.0, %v1552_v6 }
 0x164   : > { %v799_v11 = vmul.f32 %v730_v53, %v730_v53  ;;  %v735_v29 = vmul.f32 %v1083_v7, %v1814_v21  ;;  %v614_v21 = vadd.s32 %v1782_v59, %v581_v18  ;;  %v613_v40 = vadd.s32 %v1782_v59, %v580_v19 }
 0x165   : > { %v760_v61 = vadd.f32 %v759_v55, %v729_v54  ;;  %v798_v62 = vmul.f32 %v729_v54, %v729_v54  ;;  %v828_v63 = vadd.f32 %v827_v51, %v797_v45  ;;  %v1210_v0 = vpop.f32.mrb[12].mxu0  ;;  %v1917_v2 = vpop.f32.mrb[12].mxu1  ;;  %v583_v41 = vadd.s32 200, %v1778_v57 }
 0x166   : > { %537 = vst [vmem:[%s1807_s23 + $0x68] sm:$0xff] %v1210_v0  ;;  %v732_v4 = vmul.f32 %v1210_v0, %v1080_v37  ;;  %v425_v5 = vpop.f32.mrb[13].mxu0  ;;  %553 = vst [vmem:[%s1807_s23 + $0xe8] sm:$0xff] %v1917_v2  ;;  %v1927_v9 = vpop.f32.mrb[13].mxu1 }
 0x167   : > { %v829_v12 = vadd.f32 %v828_v63, %v798_v62  ;;  %536 = vst [vmem:[%s1807_s23 + $0x60] sm:$0xff] %v425_v5  ;;  %v731_v13 = vmul.f32 %v1079_v48, %v425_v5  ;;  %v761_v14 = vadd.f32 %v760_v61, %v730_v53  ;;  %552 = vst [vmem:[%s1807_s23 + $0xe0] sm:$0xff] %v1927_v9 }
 0x168   : > { %v801_v27 = vmul.f32 %v732_v4, %v732_v4 }
 0x169   : > { %v762_v20 = vadd.f32 %v761_v14, %v731_v13  ;;  %v800_v22 = vmul.f32 %v731_v13, %v731_v13  ;;  %v830_v23 = vadd.f32 %v829_v12, %v799_v11  ;;  %v1213_v24 = vpop.f32.mrb[14].mxu0  ;;  %v1949_v26 = vpop.f32.mrb[14].mxu1 }
 0x16a   : > { %539 = vst [vmem:[%s1807_s23 + $0x78] sm:$0xff] %v1213_v24  ;;  %v435_v28 = vpop.f32.mrb[15].mxu0  ;;  %555 = vst [vmem:[%s1807_s23 + $0xf8] sm:$0xff] %v1949_v26  ;;  %v1960_v34 = vpop.f32.mrb[15].mxu1  ;;  %v734_v37 = vmul.f32 %v1213_v24, %v1082_v56 }
 0x16b   : > { %v831_v36 = vadd.f32 %v830_v23, %v800_v22  ;;  %538 = vst [vmem:[%s1807_s23 + $0x70] sm:$0xff] %v435_v28  ;;  %v733_v38 = vmul.f32 %v1081_v58, %v435_v28  ;;  %v763_v39 = vadd.f32 %v762_v20, %v732_v4  ;;  %554 = vst [vmem:[%s1807_s23 + $0xf0] sm:$0xff] %v1960_v34 }
 0x16c   : > { %1429 = shalt.err (!%p1426_p7)
}
 0x16d   : > { %s1430_s7 = scalar_lea.hbm %s1944_s11, 4096  ;;  %s1434_s21 = scalar_lea.hbm %s2131_s2, 8192 }
 0x16e   : > { %p1431_p9 = scmp.ne.s32.totalorder %s1944_s11, %s1430_s7  ;;  %p1435_p5 = scmp.lt.u32.totalorder %s1944_s11, %s2131_s2 }
 0x16f   : > { %p1436_p11 = scmp.lt.u32.totalorder %s1434_s21, %s1430_s7  ;;  %p1438_p4 = scmp.lt.u32.totalorder %s1430_s7, %s1944_s11 }
 0x170   : > { %p1432_p1 = pnand %p1431_p9, %p1679_p12 }
 0x171   : > { %p1437_p2 = por %p1436_p11, %p1435_p5 }
 0x172   : > { %p1433_p0 = pneg %p1432_p1 }
 0x173   : > { %p1439_p6 = por %p1438_p4, %p1437_p2 }
 0x175   : > { %p1440_p8 = pnand %p1439_p6, %p1433_p0 }
 0x177   : > { %1443 = shalt.err (!%p1440_p8)
}
 0x178   : > { %s1554_s10 = smov 128   ;;  %s1555_s28 = smov 8   ;;  %v764_v42 = vadd.f32 %v763_v39, %v733_v38  ;;  %v802_v43 = vmul.f32 %v733_v38, %v733_v38  ;;  %v832_v45 = vadd.f32 %v831_v36, %v801_v27  ;;  %v582_v46 = vadd.s32 192, %v1778_v57 }
 0x179   : > { %1292 = dma.vmem_to_hbm [thread:$0]  (%p1679_p12), %s1946_s13, 4096, %s1944_s11, %s860_s9, %s1554_s10, %s1554_s10, %s1555_s28   ;;  %v736_v48 = vmul.f32 %v1803_v16, %v1934_v15  ;;  %v804_v49 = vmul.f32 %v735_v29, %v735_v29  ;;  %v1086_v51 = vsel %vm642_vm3, 1.0, %v1552_v6  ;;  %vm644_vm5 = vcmp.lt.s32.totalorder %v1956_v33, 512 }
 0x17a   : > { %v803_v53 = vmul.f32 %v734_v37, %v734_v37  ;;  %v765_v54 = vadd.f32 %v764_v42, %v734_v37  ;;  %v833_v55 = vadd.f32 %v832_v45, %v802_v43  ;;  %v737_v56 = vmul.f32 %v1085_v32, %v1831_v35  ;;  %s1064_s13 = sshll.u32 %s1730_s14, 3  ;;  %s864_s11 = sand.u32 1, %s1604_s19  }
 0x17b   : > { %v1087_v58 = vsel %vm643_vm4, 1.0, %v1552_v6  ;;  %vm646_vm6 = vcmp.lt.s32.totalorder %v614_v21, 512  ;;  %vm645_vm7 = vcmp.lt.s32.totalorder %v613_v40, 512  ;;  %v616_v16 = vadd.s32 %v1782_v59, %v583_v41  ;;  %s1104_s9 = sshll.u32 %s1604_s19, 7  ;;  %s241_s26 = scalar_lea.vmem [#allocation8], %s1064_s13 }
 0x17c   : > { %v834_v60 = vadd.f32 %v833_v55, %v803_v53  ;;  %v766_v61 = vadd.f32 %v765_v54, %v735_v29  ;;  %v615_v62 = vadd.s32 %v1782_v59, %v582_v46  ;;  %v584_v63 = vadd.s32 208, %v1778_v57  ;;  %s899_s25 = sshll.u32 %s241_s26, 4  ;;  %s2045_s24 = scalar_lea.vmem [#allocation10], %s1064_s13  ;;  %s2053_s25 = int_to_ptr.vmem [resolvable:$true] %s899_s25 }
 0x17d   : > { %v805_v0 = vmul.f32 %v736_v48, %v736_v48  ;;  %v738_v1 = vmul.f32 %v1824_v31, %v1086_v51  ;;  %v1088_v4 = vsel %vm644_vm5, 1.0, %v1552_v6  ;;  %v585_v35 = vadd.s32 216, %v1778_v57  ;;  %s912_s6 = sshll.u32 %s2045_s24, 4  ;;  %s2051_s8 = scalar_lea.hbm %s2132_s3, %s1104_s9  ;;  %s2060_s6 = int_to_ptr.vmem [resolvable:$true] %s912_s6 }
 0x17e   : > { %v835_v5 = vadd.f32 %v834_v60, %v804_v49  ;;  %v767_v7 = vadd.f32 %v766_v61, %v736_v48  ;;  %v806_v8 = vmul.f32 %v737_v56, %v737_v56  ;;  %v739_v11 = vmul.f32 %v1087_v58, %v1851_v52  ;;  %s2058_s21 = scalar_lea.hbm %s2133_s4, %s1104_s9  ;;  %s2062_s23 = scalar_lea.sflag [#allocation9], %s864_s11 }
 0x17f   : > { %v1090_v12 = vsel %vm646_vm6, 1.0, %v1552_v6  ;;  %v1089_v13 = vsel %vm645_vm7, 1.0, %v1552_v6  ;;  %vm648_vm8 = vcmp.lt.s32.totalorder %v616_v16, 512  ;;  %v586_v14 = vadd.s32 224, %v1778_v57  ;;  %s1444_s12 = scalar_lea.vmem %s2053_s25, 128  ;;  %s1556_s10 = smov [#allocation8]  }
 0x180   : > { %v768_v15 = vadd.f32 %v767_v7, %v737_v56  ;;  %v836_v17 = vadd.f32 %v835_v5, %v805_v0  ;;  %vm647_vm9 = vcmp.lt.s32.totalorder %v615_v62, 512  ;;  %v617_v31 = vadd.s32 %v1782_v59, %v584_v63  ;;  %p1445_p10 = scmp.ne.s32.totalorder %s2053_s25, %s1444_s12  ;;  %s1448_s28 = sshll.u32 %s1556_s10, 4  ;;  %s1449_s28 = int_to_ptr.vmem [resolvable:$false] %s1448_s28 }
 0x181   : > { %v807_v18 = vmul.f32 %v738_v1, %v738_v1  ;;  %v740_v19 = vmul.f32 %v1844_v47, %v1088_v4  ;;  %v618_v20 = vadd.s32 %v1782_v59, %v585_v35  ;;  %v587_v22 = vadd.s32 232, %v1778_v57  ;;  %s1450_s13 = scalar_lea.vmem %s1449_s28, 256  ;;  %p1451_p7 = scmp.lt.s32.totalorder %s2053_s25, %s1449_s28 }
 0x182   : > { %v837_v52 = vadd.f32 %v836_v17, %v806_v8  ;;  %v769_v23 = vadd.f32 %v768_v15, %v738_v1  ;;  %v808_v24 = vmul.f32 %v739_v11, %v739_v11  ;;  %v741_v27 = vmul.f32 %v1089_v13, %v1870_v10  ;;  %p1446_p13 = pnand %p1445_p10, %p1679_p12  ;;  %p1452_p9 = scmp.lt.s32.totalorder %s1450_s13, %s1444_s12 }
 0x183   : > { %v1092_v28 = vsel %vm648_vm8, 1.0, %v1552_v6  ;;  %v1091_v29 = vsel %vm647_vm9, 1.0, %v1552_v6  ;;  %v619_v32 = vadd.s32 %v1782_v59, %v586_v14  ;;  %vm649_vm10 = vcmp.lt.s32.totalorder %v617_v31, 512 }
 0x184   : > { %v770_v33 = vadd.f32 %v769_v23, %v739_v11  ;;  %v838_v36 = vadd.f32 %v837_v52, %v807_v18  ;;  %v588_v47 = vadd.s32 240, %v1778_v57  ;;  %v809_v37 = vmul.f32 %v740_v19, %v740_v19  ;;  %p1447_p3 = pneg %p1446_p13  ;;  %p1453_p1 = por %p1452_p9, %p1451_p7 }
 0x185   : > { %v742_v38 = vmul.f32 %v1861_v3, %v1090_v12  ;;  %vm650_vm11 = vcmp.lt.s32.totalorder %v618_v20, 512  ;;  %v620_v39 = vadd.s32 %v1782_v59, %v587_v22  ;;  %v810_v10 = vmul.f32 %v741_v27, %v741_v27 }
 0x186   : > { %v839_v21 = vadd.f32 %v838_v36, %v808_v24  ;;  %v771_v40 = vadd.f32 %v770_v33, %v740_v19  ;;  %v743_v41 = vmul.f32 %v1091_v29, %v1887_v30  ;;  %v1093_v42 = vsel %vm649_vm10, 1.0, %v1552_v6  ;;  %p1454_p0 = pnand %p1453_p1, %p1447_p3 }
 0x187   : > { %vm651_vm12 = vcmp.lt.s32.totalorder %v619_v32, 512  ;;  %v589_v46 = vadd.s32 248, %v1778_v57  ;;  %v621_v48 = vadd.s32 %v1782_v59, %v588_v47  ;;  %v811_v49 = vmul.f32 %v742_v38, %v742_v38 }
 0x188   : > { %v772_v43 = vadd.f32 %v771_v40, %v741_v27  ;;  %v840_v45 = vadd.f32 %v839_v21, %v809_v37  ;;  %v744_v3 = vmul.f32 %v1880_v25, %v1092_v28  ;;  %v1094_v51 = vsel %vm650_vm11, 1.0, %v1552_v6 }
 0x189   : > { %vm652_vm13 = vcmp.lt.s32.totalorder %v620_v39, 512  ;;  %v812_v55 = vmul.f32 %v743_v41, %v743_v41  ;;  %v745_v30 = vmul.f32 %v1093_v42, %v1904_v50  ;;  %v1095_v56 = vsel %vm651_vm12, 1.0, %v1552_v6 }
 0x18a   : > { %v841_v53 = vadd.f32 %v840_v45, %v810_v10  ;;  %v773_v54 = vadd.f32 %v772_v43, %v742_v38  ;;  %v622_v60 = vadd.s32 %v1782_v59, %v589_v46  ;;  %vm653_vm14 = vcmp.lt.s32.totalorder %v621_v48, 512 }
 0x18b   : > { %v813_v57 = vmul.f32 %v744_v3, %v744_v3  ;;  %v746_v61 = vmul.f32 %v1896_v44, %v1094_v51  ;;  %v1096_v25 = vsel %vm652_vm13, 1.0, %v1552_v6  ;;  %v814_v0 = vmul.f32 %v745_v30, %v745_v30 }
 0x18c   : > { %v774_v58 = vadd.f32 %v773_v54, %v743_v41  ;;  %v842_v16 = vadd.f32 %v841_v53, %v811_v49  ;;  %v747_v1 = vmul.f32 %v1095_v56, %v1927_v9  ;;  %v1097_v4 = vsel %vm653_vm14, 1.0, %v1552_v6 }
 0x18d   : > { %vm654_vm15 = vcmp.lt.s32.totalorder %v622_v60, 512  ;;  %v815_v5 = vmul.f32 %v746_v61, %v746_v61  ;;  %v748_v7 = vmul.f32 %v1917_v2, %v1096_v25  ;;  %v749_v44 = vmul.f32 %v1097_v4, %v1960_v34 }
 0x18e   : > { %v843_v62 = vadd.f32 %v842_v16, %v812_v55  ;;  %v775_v63 = vadd.f32 %v774_v58, %v744_v3  ;;  %v816_v11 = vmul.f32 %v747_v1, %v747_v1  ;;  %v1098_v12 = vsel %vm654_vm15, 1.0, %v1552_v6 }
 0x18f   : > { %v817_v15 = vmul.f32 %v748_v7, %v748_v7  ;;  %v750_v17 = vmul.f32 %v1949_v26, %v1098_v12  ;;  %v818_v18 = vmul.f32 %v749_v44, %v749_v44 }
 0x190   : > { %v776_v50 = vadd.f32 %v775_v63, %v745_v30  ;;  %v844_v35 = vadd.f32 %v843_v62, %v813_v57 }
 0x191   : > { %v819_v20 = vmul.f32 %v750_v17, %v750_v17 }
 0x192   : > { %v845_v59 = vadd.f32 %v844_v35, %v814_v0  ;;  %v777_v8 = vadd.f32 %v776_v50, %v746_v61 }
 0x194   : > { %v778_v13 = vadd.f32 %v777_v8, %v747_v1  ;;  %v846_v14 = vadd.f32 %v845_v59, %v815_v5 }
 0x196   : > { %v847_v9 = vadd.f32 %v846_v14, %v816_v11  ;;  %v779_v31 = vadd.f32 %v778_v13, %v748_v7 }
 0x198   : > { %v780_v19 = vadd.f32 %v779_v31, %v749_v44  ;;  %v848_v2 = vadd.f32 %v847_v9, %v817_v15 }
 0x19a   : > { %v781_v22 = vadd.f32 %v780_v19, %v750_v17  ;;  %v849_v52 = vadd.f32 %v848_v2, %v818_v18 }
 0x19c   : > { %v782_v23 = vrot.slane %v781_v22, 4  ;;  %v850_v34 = vadd.f32 %v849_v52, %v819_v20 }
 0x19e   : > { %v783_v24 = vadd.f32 %v782_v23, %v781_v22  ;;  %v851_v6 = vrot.slane %v850_v34, 4 }
 0x1a0   : > { %v784_v27 = vrot.slane %v783_v24, 2  ;;  %v852_v28 = vadd.f32 %v851_v6, %v850_v34 }
 0x1a2   : > { %v785_v29 = vadd.f32 %v784_v27, %v783_v24  ;;  %v853_v32 = vrot.slane %v852_v28, 2 }
 0x1a4   : > { %v786_v26 = vrot.slane %v785_v29, 1  ;;  %v854_v33 = vadd.f32 %v853_v32, %v852_v28 }
 0x1a6   : > { %v855_v36 = vrot.slane %v854_v33, 1  ;;  %v787_v47 = vadd.f32 %v786_v26, %v785_v29 }
 0x1a8   : > { %v856_v37 = vadd.f32 %v855_v36, %v854_v33  ;;  %857 = vst [vmem:[%s241_s26] sm:$0xff] %v787_v47 }
 0x1a9   : > { %1457 = shalt.err (!%p1454_p0)
}
 0x1aa   : > { %s1458_s11 = scalar_lea.hbm %s2051_s8, 128  ;;  %s1462_s14 = scalar_lea.hbm %s2132_s3, 256 }
 0x1ab   : > { %p1459_p5 = scmp.ne.s32.totalorder %s2051_s8, %s1458_s11  ;;  %p1463_p4 = scmp.lt.u32.totalorder %s2051_s8, %s2132_s3 }
 0x1ac   : > { %p1464_p6 = scmp.lt.u32.totalorder %s1462_s14, %s1458_s11  ;;  %p1466_p10 = scmp.lt.u32.totalorder %s1458_s11, %s2051_s8 }
 0x1ad   : > { %p1460_p11 = pnand %p1459_p5, %p1679_p12 }
 0x1ae   : > { %p1465_p8 = por %p1464_p6, %p1463_p4 }
 0x1af   : > { %p1461_p2 = pneg %p1460_p11 }
 0x1b0   : > { %p1467_p13 = por %p1466_p10, %p1465_p8 }
 0x1b2   : > { %p1468_p3 = pnand %p1467_p13, %p1461_p2 }
 0x1b4   : > { %1471 = shalt.err (!%p1468_p3)
}
 0x1b5   : > { %1293 = dma.vmem_to_hbm [thread:$0]  (%p1679_p12), %s2053_s25, 128, %s2051_s8, %s2062_s23   ;;  %858 = vst [vmem:[%s2045_s24] sm:$0xff] %v856_v37 }
 0x1b6   : > { %s1472_s29 = scalar_lea.vmem %s2060_s6, 128  ;;  %s1557_s12 = smov [#allocation10]  }
 0x1b7   : > { %p1473_p7 = scmp.ne.s32.totalorder %s2060_s6, %s1472_s29  ;;  %s1476_s10 = sshll.u32 %s1557_s12, 4  ;;  %s1477_s10 = int_to_ptr.vmem [resolvable:$false] %s1476_s10 }
 0x1b8   : > { %s1478_s28 = scalar_lea.vmem %s1477_s10, 256  ;;  %p1479_p0 = scmp.lt.s32.totalorder %s2060_s6, %s1477_s10 }
 0x1b9   : > { %p1474_p9 = pnand %p1473_p7, %p1679_p12  ;;  %p1480_p5 = scmp.lt.s32.totalorder %s1478_s28, %s1472_s29 }
 0x1bb   : > { %p1475_p1 = pneg %p1474_p9  ;;  %p1481_p11 = por %p1480_p5, %p1479_p0 }
 0x1bd   : > { %p1482_p2 = pnand %p1481_p11, %p1475_p1 }
 0x1bf   : > { %1485 = shalt.err (!%p1482_p2)
}
 0x1c0   : > { %s1486_s25 = scalar_lea.hbm %s2058_s21, 128  ;;  %s1490_s13 = scalar_lea.hbm %s2133_s4, 256 }
 0x1c1   : > { %p1487_p4 = scmp.ne.s32.totalorder %s2058_s21, %s1486_s25  ;;  %p1491_p10 = scmp.lt.u32.totalorder %s2058_s21, %s2133_s4 }
 0x1c2   : > { %p1492_p13 = scmp.lt.u32.totalorder %s1490_s13, %s1486_s25  ;;  %p1494_p7 = scmp.lt.u32.totalorder %s1486_s25, %s2058_s21 }
 0x1c3   : > { %p1488_p6 = pnand %p1487_p4, %p1679_p12 }
 0x1c4   : > { %p1493_p3 = por %p1492_p13, %p1491_p10 }
 0x1c5   : > { %p1489_p8 = pneg %p1488_p6 }
 0x1c6   : > { %p1495_p9 = por %p1494_p7, %p1493_p3 }
 0x1c8   : > { %p1496_p1 = pnand %p1495_p9, %p1489_p8 }
 0x1ca   : > { %1499 = shalt.err (!%p1496_p1)
}
 0x1cb   : > { %1294 = dma.vmem_to_hbm [thread:$0]  (%p1679_p12), %s2060_s6, 128, %s2058_s21, %s2062_s23  }
 0x1cc PF: > { %s924_s26 = sand.u32 1, %s1534_s15   ;;  %p2148_p0 = scmp.ne.s32.totalorder %s2138_s22, 0 }
 0x1cd   : > { %p2149_p5 = scmp.ge.s32.totalorder %s1546_s18, 2  ;;  %s925_s14 = scalar_lea.sflag [#allocation4], %s924_s26 }
 0x1cf   : > { %p1307_p11 = pnand %p2149_p5, %p2148_p0 }
 0x1d1   : > { %1525 = dma.done.wait (!%p1307_p11), %s925_s14, 4096  }
 0x1d2   : > { %1527 = vsyncadd (!%p1307_p11), %s925_s14, 4294963200  ;;  %s933_s7 = sand.u32 1, %s1053_s20  }
 0x1d3   : > { %s934_s19 = scalar_lea.sflag [#allocation9], %s933_s7 }
 0x1d4   : > { %1529 = dma.done.wait (!%p1307_p11), %s934_s19, 256  }
 0x1d5   : > { %1531 = vsyncadd (!%p1307_p11), %s934_s19, 4294967040  ;;  %p22_p12 = scmp.ge.s32.totalorder %s1641_s27, 4   ;;  %s2150_s15 = smov %s1538_s16 }
 0x1d6   : > { %s2151_s16 = smov %s1542_s17  ;;  %s2152_s17 = smov %s1675_s30 }
 0x1d7   : > { %s2153_s18 = smov %s1641_s27  ;;  %24 = sbr.rel (!%p22_p12) target bundleno = 8 (0x8), region = 109 }
 0x1de   :  { %948 = vsyncpa [#allocation3], 1 }
 0x1df   :  { %950 = vsyncpa [#allocation3 + $0x1], 1 }
 0x1e0   :  { %951 = vsyncpa [#allocation6], 1 }
 0x1e1   :  { %952 = vsyncpa [#allocation4], 1 }
 0x1e2   :  { %954 = vsyncpa [#allocation4 + $0x1], 1 }
 0x1e3   :  { %955 = vsyncpa [#allocation9], 1 }
 0x1e4   :  { %957 = vsyncpa [#allocation9 + $0x1], 1 }

</bundles_post_ra>
